<compile_context>
chip_gen: v5e
topology: v5e:2x2
jax: 0.10.0
libtpu: 0.0.40
codegen_flags: <defaults>
</compile_context>

<pallas_src>
import jax
import jax.numpy as jnp
from jax.experimental import pallas as pl
from jax.experimental.pallas import tpu as pltpu

LANE = 128
SUBLANE = 8


def _round_up(n, m):
    return ((n + m - 1) // m) * m


# ----------------------------------------------------------------------------
# Parameter packing (host side, done once).
# ----------------------------------------------------------------------------
def pack_params(params, input_size, bottleneck_dim=32, hidden=64, clf_hidden=16,
                weight_dtype=jnp.bfloat16):
    """Pack 6 (w, b) pairs into one bf16 weight slab + one f32 bias slab.

    Each layer gets its own 128-lane-aligned column band; the layer's weight
    [din, dout] lives at rows [0:din] of that band, its bias at row 0 of the
    bias slab in the same band.  The clf2 weight (16, 1) is stored TRANSPOSED
    as a (1, 16) row so the kernel can do a VPU reduce instead of a matmul.
    """
    layer_order = ["enc1", "enc2", "dec1", "dec2", "clf1", "clf2"]
    band_widths = {
        "enc1": _round_up(hidden, LANE),
        "enc2": _round_up(bottleneck_dim, LANE),
        "dec1": _round_up(hidden, LANE),
        "dec2": _round_up(input_size, LANE),
        "clf1": _round_up(clf_hidden, LANE),
        "clf2": _round_up(clf_hidden, LANE),   # holds the transposed (1, 16) weight
    }
    offsets, col = {}, 0
    for name in layer_order:
        offsets[name] = col
        col += band_widths[name]
    total_cols = col

    rows = _round_up(max(input_size, hidden, bottleneck_dim, clf_hidden), SUBLANE)
    rows = _round_up(rows, 16)   # clean bf16 sublane packing

    w_slab = jnp.zeros((rows, total_cols), jnp.float32)
    b_slab = jnp.zeros((1, total_cols), jnp.float32)
    for name in layer_order:
        w, b = params[name]
        off = offsets[name]
        if name == "clf2":
            # store transposed so the kernel reads a (1, clf_hidden) row vector
            w_slab = w_slab.at[0:1, off:off + w.shape[0]].set(w.T)
        else:
            din, dout = w.shape
            w_slab = w_slab.at[0:din, off:off + dout].set(w)
        b_slab = b_slab.at[0:1, off:off + b.shape[1]].set(b)

    w_slab = w_slab.astype(weight_dtype)
    meta = dict(offsets=offsets, input_size=input_size, hidden=hidden,
                bottleneck=bottleneck_dim, clf_hidden=clf_hidden,
                rows=rows, total_cols=total_cols)
    return w_slab, b_slab, meta


# ----------------------------------------------------------------------------
# Kernel.
# ----------------------------------------------------------------------------
def _make_kernel(meta, compute_dtype):
    input_size = meta["input_size"]
    hidden = meta["hidden"]
    bottleneck = meta["bottleneck"]
    clf_hidden = meta["clf_hidden"]
    offs = meta["offsets"]
    f32 = jnp.float32

    def linear_relu(a, w_ref, b_ref, din, off, dout):
        w = w_ref[0:din, off:off + dout]            # bf16 (or f32) weight tile
        b = b_ref[0:1, off:off + dout]              # f32 bias row
        y = jnp.dot(a, w, preferred_element_type=f32) + b
        return jnp.maximum(y, 0.0)                  # f32 on the vector path

    def kernel(x_ref, w_ref, b_ref, o_ref):
        x = x_ref[...]                              # already compute_dtype

        # --- encoder ---
        h1 = linear_relu(x, w_ref, b_ref, input_size, offs["enc1"], hidden)
        enc = linear_relu(h1.astype(compute_dtype), w_ref, b_ref,
                          hidden, offs["enc2"], bottleneck)
        # --- decoder ---
        h3 = linear_relu(enc.astype(compute_dtype), w_ref, b_ref,
                         bottleneck, offs["dec1"], hidden)
        dec = linear_relu(h3.astype(compute_dtype), w_ref, b_ref,
                          hidden, offs["dec2"], input_size)
        # --- classifier head ---
        h5 = linear_relu(enc.astype(compute_dtype), w_ref, b_ref,
                         bottleneck, offs["clf1"], clf_hidden)
        # Linear(16, 1): elementwise multiply + lane reduce (VPU/XLU), no MXU push.
        w6 = w_ref[0:1, offs["clf2"]:offs["clf2"] + clf_hidden].astype(f32)  # (1, 16)
        b6 = b_ref[0:1, offs["clf2"]:offs["clf2"] + 1]                        # (1, 1)
        logit = jnp.sum(h5 * w6, axis=-1, keepdims=True) + b6                 # (TB, 1)

        # Single lane-dense output block: decoded in [:, :input_size],
        # classifier logit at column input_size, zero padding elsewhere.
        o_ref[...] = jnp.zeros(o_ref.shape, f32)
        o_ref[:, 0:input_size] = dec
        o_ref[:, input_size:input_size + 1] = logit

    return kernel


# ----------------------------------------------------------------------------
# Wrapper.
# ----------------------------------------------------------------------------
def autoencoder_classifier_forward(x, w_slab, b_slab, meta,
                                   compute_dtype=jnp.bfloat16):
    """x: [B, input_size] float32. Returns (output [B,1], decoded [B,input_size])."""
    B, input_size = x.shape
    assert input_size == meta["input_size"]
    out_pad = _round_up(input_size + 1, LANE)

    # Batch tile: multiple of 16 (bf16 sublane packing); >=512 rows when the
    # batch is large to amortize per-grid-step overhead.
    TB = 512 if B >= 512 else _round_up(B, 16)
    Bp = _round_up(B, TB)
    if Bp != B:
        x = jnp.pad(x, ((0, Bp - B), (0, 0)))
    x = x.astype(compute_dtype)       # halves the x DMA; MXU accumulates in f32

    grid = (Bp // TB,)
    kernel = _make_kernel(meta, compute_dtype)

    # VMEM budget from actual footprint: resident slabs + double-buffered
    # x / output tiles, plus headroom.  Stays well under v7x's 64 MiB.
    itemsize = jnp.dtype(compute_dtype).itemsize
    vmem_bytes = (w_slab.size * w_slab.dtype.itemsize
                  + b_slab.size * b_slab.dtype.itemsize
                  + 2 * TB * input_size * itemsize
                  + 2 * TB * out_pad * 4
                  + (2 << 20))
    vmem_bytes = int(min(max(vmem_bytes, 4 << 20), 48 << 20))

    slab = pl.pallas_call(
        kernel,
        grid=grid,
        in_specs=[
            pl.BlockSpec((TB, input_size), lambda i: (i, 0)),     # x: tiled over batch
            pl.BlockSpec(w_slab.shape, lambda i: (0, 0)),         # weights: VMEM-resident
            pl.BlockSpec(b_slab.shape, lambda i: (0, 0)),         # biases: VMEM-resident
        ],
        out_specs=pl.BlockSpec((TB, out_pad), lambda i: (i, 0)),
        out_shape=jax.ShapeDtypeStruct((Bp, out_pad), jnp.float32),
        compiler_params=pltpu.CompilerParams(
            dimension_semantics=("parallel",),    # shards batch steps across TCs on v7x
            vmem_limit_bytes=vmem_bytes,
        ),
    )(x, w_slab, b_slab)

    decoded = slab[:B, :input_size]
    output = slab[:B, input_size:input_size + 1]
    return output, decoded


# ----------------------------------------------------------------------------
# Init + pure-JAX reference (mirrors the PyTorch forward, with the same bf16
# rounding of matmul inputs as the kernel so the comparison is tight).
# ----------------------------------------------------------------------------
def init_params(key, input_size, bottleneck_dim=32):
    dims = {
        "enc1": (input_size, 64),
        "enc2": (64, bottleneck_dim),
        "dec1": (bottleneck_dim, 64),
        "dec2": (64, input_size),
        "clf1": (bottleneck_dim, 16),
        "clf2": (16, 1),
    }
    params = {}
    for name, (din, dout) in dims.items():
        key, kw, kb = jax.random.split(key, 3)
        scale = 1.0 / jnp.sqrt(jnp.float32(din))   # mimic PyTorch Linear fan-in scaling
        w = jax.random.uniform(kw, (din, dout), jnp.float32, -scale, scale)
        b = jax.random.uniform(kb, (1, dout), jnp.float32, -scale, scale)
        params[name] = (w, b)
    return params


def reference_forward(x, params, compute_dtype=jnp.bfloat16):
    f32 = jnp.float32
    cd = compute_dtype

    def lin_relu(a, w, b):
        y = jnp.dot(a.astype(cd), w.astype(cd), preferred_element_type=f32) + b.astype(f32)
        return jnp.maximum(y, 0.0)

    w1, b1 = params["enc1"]; w2, b2 = params["enc2"]
    w3, b3 = params["dec1"]; w4, b4 = params["dec2"]
    w5, b5 = params["clf1"]; w6, b6 = params["clf2"]
    h1 = lin_relu(x, w1, b1)
    enc = lin_relu(h1, w2, b2)
    h3 = lin_relu(enc, w3, b3)
    dec = lin_relu(h3, w4, b4)
    h5 = lin_relu(enc, w5, b5)
    w6c = w6.astype(cd).astype(f32).reshape(1, -1)   # same bf16 rounding as the packed slab
    out = jnp.sum(h5 * w6c, axis=-1, keepdims=True) + b6.astype(f32)
    return out, dec


if __name__ == "__main__":
    key = jax.random.PRNGKey(0)
    batch = 8
    input_size = 16        # X_train.shape[1] stand-in
    bottleneck_dim = 32

    key, kx, kp = jax.random.split(key, 3)
    x = jax.random.normal(kx, (batch, input_size), jnp.float32)
    params = init_params(kp, input_size, bottleneck_dim)

    w_slab, b_slab, meta = pack_params(params, input_size, bottleneck_dim)

    out, dec = autoencoder_classifier_forward(x, w_slab, b_slab, meta)
    out, dec = jax.block_until_ready((out, dec))

    ref_out, ref_dec = reference_forward(x, params)
    assert out.shape == (batch, 1) and dec.shape == (batch, input_size)
    assert jnp.allclose(out, ref_out, atol=1e-3, rtol=1e-3), "classifier output mismatch"
    assert jnp.allclose(dec, ref_dec, atol=1e-3, rtol=1e-3), "decoded output mismatch"

    print("KERNEL_OK")
</pallas_src>

<mosaic_0001>
module attributes {stable_mosaic.version = 11 : i64} {
  func.func @kernel(%arg0: i32, %arg1: memref<16x16xbf16, #tpu.memory_space<vmem>>, %arg2: memref<64x768xbf16, #tpu.memory_space<vmem>>, %arg3: memref<1x768xf32, #tpu.memory_space<vmem>>, %arg4: memref<16x128xf32, #tpu.memory_space<vmem>>) attributes {dimension_semantics = [#tpu.dimension_semantics<parallel>], iteration_bounds = array<i64: 1>, scalar_prefetch = 0 : i64, scratch_operands = 0 : i64, tpu.core_type = #tpu.core_type<tc>, window_params = [{transform_indices = @transform_0, window_bounds = array<i64: 16, 16>}, {pipeline_mode = #tpu.pipeline_mode<synchronous>, transform_indices = @transform_1, window_bounds = array<i64: 64, 768>}, {pipeline_mode = #tpu.pipeline_mode<synchronous>, transform_indices = @transform_2, window_bounds = array<i64: 1, 768>}, {transform_indices = @transform_3, window_bounds = array<i64: 16, 128>}]} {
    %c0 = arith.constant 0 : index
    %c0_0 = arith.constant 0 : index
    %0 = vector.load %arg1[%c0, %c0_0] : memref<16x16xbf16, #tpu.memory_space<vmem>>, vector<16x16xbf16>
    %c0_1 = arith.constant 0 : index
    %c0_2 = arith.constant 0 : index
    %1 = vector.load %arg2[%c0_1, %c0_2] : memref<64x768xbf16, #tpu.memory_space<vmem>>, vector<16x64xbf16>
    %c0_3 = arith.constant 0 : index
    %c0_4 = arith.constant 0 : index
    %2 = vector.load %arg3[%c0_3, %c0_4] : memref<1x768xf32, #tpu.memory_space<vmem>>, vector<1x64xf32>
    %cst = arith.constant dense<0.000000e+00> : vector<16x64xf32>
    %3 = tpu.matmul %0, %1, %cst {dimension_numbers = #tpu.dot_dimension_numbers<[1], [0], [0], [1], [0, 0, 1, 1], [], []>} : vector<16x16xbf16>, vector<16x64xbf16>, vector<16x64xf32> -> vector<16x64xf32>
    %4 = vector.broadcast %2 : vector<1x64xf32> to vector<16x64xf32>
    %5 = arith.addf %3, %4 : vector<16x64xf32>
    %cst_5 = arith.constant 0.000000e+00 : f32
    %6 = vector.broadcast %cst_5 : f32 to vector<16x64xf32>
    %7 = arith.maximumf %5, %6 : vector<16x64xf32>
    %8 = arith.truncf %7 : vector<16x64xf32> to vector<16x64xbf16>
    %c0_6 = arith.constant 0 : index
    %c128 = arith.constant 128 : index
    %9 = vector.load %arg2[%c0_6, %c128] : memref<64x768xbf16, #tpu.memory_space<vmem>>, vector<64x32xbf16>
    %c0_7 = arith.constant 0 : index
    %c128_8 = arith.constant 128 : index
    %10 = vector.load %arg3[%c0_7, %c128_8] : memref<1x768xf32, #tpu.memory_space<vmem>>, vector<1x32xf32>
    %cst_9 = arith.constant dense<0.000000e+00> : vector<16x32xf32>
    %11 = tpu.matmul %8, %9, %cst_9 {dimension_numbers = #tpu.dot_dimension_numbers<[1], [0], [0], [1], [0, 0, 1, 1], [], []>} : vector<16x64xbf16>, vector<64x32xbf16>, vector<16x32xf32> -> vector<16x32xf32>
    %12 = vector.broadcast %10 : vector<1x32xf32> to vector<16x32xf32>
    %13 = arith.addf %11, %12 : vector<16x32xf32>
    %cst_10 = arith.constant 0.000000e+00 : f32
    %14 = vector.broadcast %cst_10 : f32 to vector<16x32xf32>
    %15 = arith.maximumf %13, %14 : vector<16x32xf32>
    %16 = arith.truncf %15 : vector<16x32xf32> to vector<16x32xbf16>
    %c0_11 = arith.constant 0 : index
    %c256 = arith.constant 256 : index
    %17 = vector.load %arg2[%c0_11, %c256] : memref<64x768xbf16, #tpu.memory_space<vmem>>, vector<32x64xbf16>
    %c0_12 = arith.constant 0 : index
    %c256_13 = arith.constant 256 : index
    %18 = vector.load %arg3[%c0_12, %c256_13] : memref<1x768xf32, #tpu.memory_space<vmem>>, vector<1x64xf32>
    %cst_14 = arith.constant dense<0.000000e+00> : vector<16x64xf32>
    %19 = tpu.matmul %16, %17, %cst_14 {dimension_numbers = #tpu.dot_dimension_numbers<[1], [0], [0], [1], [0, 0, 1, 1], [], []>} : vector<16x32xbf16>, vector<32x64xbf16>, vector<16x64xf32> -> vector<16x64xf32>
    %20 = vector.broadcast %18 : vector<1x64xf32> to vector<16x64xf32>
    %21 = arith.addf %19, %20 : vector<16x64xf32>
    %cst_15 = arith.constant 0.000000e+00 : f32
    %22 = vector.broadcast %cst_15 : f32 to vector<16x64xf32>
    %23 = arith.maximumf %21, %22 : vector<16x64xf32>
    %24 = arith.truncf %23 : vector<16x64xf32> to vector<16x64xbf16>
    %c0_16 = arith.constant 0 : index
    %c384 = arith.constant 384 : index
    %25 = vector.load %arg2[%c0_16, %c384] : memref<64x768xbf16, #tpu.memory_space<vmem>>, vector<64x16xbf16>
    %c0_17 = arith.constant 0 : index
    %c384_18 = arith.constant 384 : index
    %26 = vector.load %arg3[%c0_17, %c384_18] : memref<1x768xf32, #tpu.memory_space<vmem>>, vector<1x16xf32>
    %cst_19 = arith.constant dense<0.000000e+00> : vector<16x16xf32>
    %27 = tpu.matmul %24, %25, %cst_19 {dimension_numbers = #tpu.dot_dimension_numbers<[1], [0], [0], [1], [0, 0, 1, 1], [], []>} : vector<16x64xbf16>, vector<64x16xbf16>, vector<16x16xf32> -> vector<16x16xf32>
    %28 = vector.broadcast %26 : vector<1x16xf32> to vector<16x16xf32>
    %29 = arith.addf %27, %28 : vector<16x16xf32>
    %cst_20 = arith.constant 0.000000e+00 : f32
    %30 = vector.broadcast %cst_20 : f32 to vector<16x16xf32>
    %31 = arith.maximumf %29, %30 : vector<16x16xf32>
    %32 = arith.truncf %15 : vector<16x32xf32> to vector<16x32xbf16>
    %c0_21 = arith.constant 0 : index
    %c512 = arith.constant 512 : index
    %33 = vector.load %arg2[%c0_21, %c512] : memref<64x768xbf16, #tpu.memory_space<vmem>>, vector<32x16xbf16>
    %c0_22 = arith.constant 0 : index
    %c512_23 = arith.constant 512 : index
    %34 = vector.load %arg3[%c0_22, %c512_23] : memref<1x768xf32, #tpu.memory_space<vmem>>, vector<1x16xf32>
    %cst_24 = arith.constant dense<0.000000e+00> : vector<16x16xf32>
    %35 = tpu.matmul %32, %33, %cst_24 {dimension_numbers = #tpu.dot_dimension_numbers<[1], [0], [0], [1], [0, 0, 1, 1], [], []>} : vector<16x32xbf16>, vector<32x16xbf16>, vector<16x16xf32> -> vector<16x16xf32>
    %36 = vector.broadcast %34 : vector<1x16xf32> to vector<16x16xf32>
    %37 = arith.addf %35, %36 : vector<16x16xf32>
    %cst_25 = arith.constant 0.000000e+00 : f32
    %38 = vector.broadcast %cst_25 : f32 to vector<16x16xf32>
    %39 = arith.maximumf %37, %38 : vector<16x16xf32>
    %c0_26 = arith.constant 0 : index
    %c640 = arith.constant 640 : index
    %40 = vector.load %arg2[%c0_26, %c640] : memref<64x768xbf16, #tpu.memory_space<vmem>>, vector<1x16xbf16>
    %41 = arith.extf %40 : vector<1x16xbf16> to vector<1x16xf32>
    %c0_27 = arith.constant 0 : index
    %c640_28 = arith.constant 640 : index
    %42 = vector.load %arg3[%c0_27, %c640_28] : memref<1x768xf32, #tpu.memory_space<vmem>>, vector<1x1xf32>
    %43 = vector.broadcast %41 : vector<1x16xf32> to vector<16x16xf32>
    %44 = arith.mulf %39, %43 : vector<16x16xf32>
    %cst_29 = arith.constant dense<0.000000e+00> : vector<16xf32>
    %45 = vector.multi_reduction <add>, %44, %cst_29 [1] : vector<16x16xf32> to vector<16xf32>
    %46 = vector.shape_cast %45 : vector<16xf32> to vector<16x1xf32>
    %47 = vector.broadcast %42 : vector<1x1xf32> to vector<16x1xf32>
    %48 = arith.addf %46, %47 : vector<16x1xf32>
    %cst_30 = arith.constant 0.000000e+00 : f32
    %49 = vector.broadcast %cst_30 : f32 to vector<16x128xf32>
    %c0_31 = arith.constant 0 : index
    %c0_32 = arith.constant 0 : index
    %50 = vector.load %arg4[%c0_31, %c0_32] : memref<16x128xf32, #tpu.memory_space<vmem>>, vector<16x128xf32>
    tpu.vector_store %arg4[%c0_31, %c0_32], %49 {strides = array<i32>} : memref<16x128xf32, #tpu.memory_space<vmem>>, vector<16x128xf32>,
    %c0_33 = arith.constant 0 : index
    %c0_34 = arith.constant 0 : index
    %51 = vector.load %arg4[%c0_33, %c0_34] : memref<16x128xf32, #tpu.memory_space<vmem>>, vector<16x16xf32>
    tpu.vector_store %arg4[%c0_33, %c0_34], %31 {strides = array<i32>} : memref<16x128xf32, #tpu.memory_space<vmem>>, vector<16x16xf32>,
    %c0_35 = arith.constant 0 : index
    %c16 = arith.constant 16 : index
    %52 = vector.load %arg4[%c0_35, %c16] : memref<16x128xf32, #tpu.memory_space<vmem>>, vector<16x1xf32>
    tpu.vector_store %arg4[%c0_35, %c16], %48 {strides = array<i32>} : memref<16x128xf32, #tpu.memory_space<vmem>>, vector<16x1xf32>,
    return
  }
  func.func @transform_0(%arg0: i32) -> (i32, i32) {
    %c0_i32 = arith.constant 0 : i32
    %c0_i32_0 = arith.constant 0 : i32
    return %arg0, %c0_i32 : i32, i32
  }
  func.func @transform_1(%arg0: i32) -> (i32, i32) {
    %c0_i32 = arith.constant 0 : i32
    %c0_i32_0 = arith.constant 0 : i32
    %c0_i32_1 = arith.constant 0 : i32
    return %c0_i32, %c0_i32_0 : i32, i32
  }
  func.func @transform_2(%arg0: i32) -> (i32, i32) {
    %c0_i32 = arith.constant 0 : i32
    %c0_i32_0 = arith.constant 0 : i32
    %c0_i32_1 = arith.constant 0 : i32
    return %c0_i32, %c0_i32_0 : i32, i32
  }
  func.func @transform_3(%arg0: i32) -> (i32, i32) {
    %c0_i32 = arith.constant 0 : i32
    %c0_i32_0 = arith.constant 0 : i32
    return %arg0, %c0_i32 : i32, i32
  }
}

</mosaic_0001>

<bundles_post_ra>
// kernel: tpu_custom_call.1
= control target key start
LH: loop header
LB: loop body
LE: loop exit
PB: predicated region body
PF: predicated region fallthrough
CT: control target
= control target key end

     0   :  { %8 = vsyncpa [#allocation3], 0  ;;  %s588_s0 = inlined_call_operand.hbm [shape: bf16[16,16], index: 0, kind: input, shape index: {}]   ;;  %s589_s1 = inlined_call_operand.hbm [shape: bf16[64,768], index: 1, kind: input, shape index: {}]   ;;  %s590_s2 = inlined_call_operand.hbm [shape: f32[1,768], index: 2, kind: input, shape index: {}]   ;;  %s591_s3 = inlined_call_operand.hbm [shape: f32[16,128], index: 3, kind: output, shape index: {}]  }
   0x1   :  { %9 = vsyncpa [#allocation6], 0  ;;  %s28_s14 = sshll.u32 %s589_s1, 4  ;;  %s29_s14 = int_to_ptr.hbm [resolvable:$true] %s28_s14 }
   0x2   :  { %10 = vsyncpa [#allocation4], 0  ;;  %s537_s15 = smov [#allocation5]   ;;  %s15_s19 = sshll.u32 %s588_s0, 4  ;;  %s16_s19 = int_to_ptr.hbm [resolvable:$true] %s15_s19 }
   0x3   :  { %s30_s16 = sshll.u32 %s537_s15, 4  ;;  %s538_s20 = smov 384   ;;  %s31_s16 = int_to_ptr.vmem [resolvable:$true] %s30_s16 }
   0x4   :  { %s539_s21 = smov 24   ;;  %s540_s22 = smov [#allocation2]  }
   0x5   :  { %36 = dma.hbm_to_vmem [thread:$0]  %s29_s14, 3072, %s31_s16, [#allocation6], %s538_s20, %s538_s20, %s539_s21  }
   0x6   :  { %s17_s23 = sshll.u32 %s540_s22, 4  ;;  %s541_s24 = smov 64   ;;  %s18_s23 = int_to_ptr.vmem [resolvable:$true] %s17_s23 }
   0x7   :  { %s542_s25 = smov 4   ;;  %s42_s27 = sshll.u32 %s590_s2, 4  ;;  %s43_s27 = int_to_ptr.hbm [resolvable:$true] %s42_s27 }
   0x8   :  { %23 = dma.hbm_to_vmem [thread:$0]  %s16_s19, 128, %s18_s23, [#allocation3], %s541_s24, %s541_s24, %s542_s25  }
   0x9   :  { %s543_s28 = smov [#allocation7]  }
   0xa   :  { %s44_s29 = sshll.u32 %s543_s28, 4  ;;  %s45_s29 = int_to_ptr.vmem [resolvable:$true] %s44_s29 }
   0xb   :  { %47 = dma.hbm_to_vmem [thread:$0]  %s43_s27, 96, %s45_s29, [#allocation6]  }
   0xc   :  { %531 = dma.done.wait [#allocation3], 128  }
   0xd   :  { %532 = vsyncadd [#allocation3], 4294967168 }
   0xe   :  { %533 = dma.done.wait [#allocation6], 3168  }
   0xf   :  { %534 = vsyncadd [#allocation6], 4294964128  ;;  %v348_v0 = vld [vmem:[#allocation5] sm:$0xf]  ;;  %v404_v1 = vld [vmem:[#allocation5 + $0x14] sm:$0xf0] }
  0x10   :  { %v349_v2 = vor.u32 %v404_v1, %v348_v0  ;;  %v403_v3 = vld [vmem:[#allocation2] sm:$0xff]  ;;  %vm80_vm0 = vcmask 130048   ;;  %v365_v4 = vld [vmem:[#allocation5 + $0x94] sm:$0xf]  ;;  %v408_v5 = vld [vmem:[#allocation5 + $0xa8] sm:$0xf0] }
  0x11   :  { %v366_v6 = vor.u32 %v408_v5, %v365_v4  ;;  %v361_v7 = vld [vmem:[#allocation5 + $0x64] sm:$0xf]  ;;  %v407_v8 = vld [vmem:[#allocation5 + $0x78] sm:$0xf0]  ;;  %v357_v10 = vld [vmem:[#allocation5 + $0x34] sm:$0xf] }
  0x12   :  { %91 = vmatpush.bf16.msra.mxu0 %v349_v2  ;;  %v362_v9 = vor.u32 %v407_v8, %v361_v7  ;;  %v406_v11 = vld [vmem:[#allocation5 + $0x48] sm:$0xf0]  ;;  %v353_v13 = vld [vmem:[#allocation5 + $0x4] sm:$0xf]  ;;  %v405_v14 = vld [vmem:[#allocation5 + $0x18] sm:$0xf0] }
  0x13   :  { %145 = vmatpush.bf16.msra.mxu1 %v366_v6  ;;  %v358_v12 = vor.u32 %v406_v11, %v357_v10  ;;  %v354_v15 = vor.u32 %v405_v14, %v353_v13  ;;  %v400_v16 = vld [vmem:[#allocation5 + $0x40] sm:$0xf]  ;;  %v416_v17 = vld [vmem:[#allocation5 + $0x54] sm:$0xf0]  ;;  %vm137_vm1 = vcmask 523264   ;;  %vm178_vm2 = vcmask 261120  }
  0x14   :  { %v401_v18 = vor.u32 %v416_v17, %v400_v16  ;;  %v429_v20 = vld [vmem:[#allocation7] ss:$0 sm:$0xff]  ;;  %v396_v27 = vld [vmem:[#allocation5 + $0x10] sm:$0xf]  ;;  %v415_v28 = vld [vmem:[#allocation5 + $0x24] sm:$0xf0] }
  0x15   :  { %350 = vmatmul.msk.bf16.vlgmr.msra.gmra.mxu0 %vm80_vm0, %v403_v3  ;;  %v397_v29 = vor.u32 %v415_v28, %v396_v27  ;;  %v374_v30 = vld [vmem:[#allocation5 + $0x38] sm:$0xf]  ;;  %v410_v31 = vld [vmem:[#allocation5 + $0x4c] sm:$0xf0]  ;;  %v370_v33 = vld [vmem:[#allocation5 + $0x8] sm:$0xf] }
  0x16   :  { %280 = vmatpush.bf16.msrb.mxu0 %v401_v18  ;;  %v375_v32 = vor.u32 %v410_v31, %v374_v30  ;;  %v409_v34 = vld [vmem:[#allocation5 + $0x1c] sm:$0xf0]  ;;  %v391_v44 = vld [vmem:[#allocation5 + $0x9c] sm:$0xf]  ;;  %v414_v45 = vld [vmem:[#allocation5 + $0xb0] sm:$0xf0] }
  0x17   :  { %146 = vmatpush.bf16.msra.mxu1 %v362_v9  ;;  %v371_v35 = vor.u32 %v409_v34, %v370_v33  ;;  %v430_v37 = vld [vmem:[#allocation7 + $0x1] ss:$0 sm:$0xff]  ;;  %v392_v46 = vor.u32 %v414_v45, %v391_v44  ;;  %v387_v47 = vld [vmem:[#allocation5 + $0x6c] sm:$0xf]  ;;  %v413_v48 = vld [vmem:[#allocation5 + $0x80] sm:$0xf0] }
  0x18   :  { %188 = vmatpush.bf16.msra.mxu2 %v375_v32  ;;  %v388_v49 = vor.u32 %v413_v48, %v387_v47  ;;  %v383_v50 = vld [vmem:[#allocation5 + $0x3c] sm:$0xf]  ;;  %v412_v51 = vld [vmem:[#allocation5 + $0x50] sm:$0xf0]  ;;  %v379_v53 = vld [vmem:[#allocation5 + $0xc] sm:$0xf] }
  0x19   :  { %242 = vmatpush.bf16.msra.mxu3 %v392_v46  ;;  %v384_v52 = vor.u32 %v412_v51, %v383_v50  ;;  %v411_v54 = vld [vmem:[#allocation5 + $0x20] sm:$0xf0]  ;;  %v290_v56 = vld [vmem:[#allocation5 + $0x14] sm:$0x1]  ;;  %v432_v3 = vld [vmem:[#allocation7 + $0x2] ss:$0 sm:$0xff] }
  0x1a   :  { %281 = vmatpush.bf16.msrb.mxu0 %v397_v29  ;;  %v380_v55 = vor.u32 %v411_v54, %v379_v53  ;;  %v431_v57 = vld [vmem:[#allocation7 + $0x4] ss:$0 sm:$0xff]  ;;  %v291_v58 = vunpack.c.l.bf16 %v290_v56  ;;  %v433_v14 = vld [vmem:[#allocation7 + $0x5] ss:$0 sm:$0xff]  ;;  %v544_v17 = vmov 0.0   ;;  %s545_s0 = smov 16  }
  0x1b   :  { %147 = vmatpush.bf16.msra.mxu1 %v358_v12  ;;  %307 = vst [vmem:[#allocation8] sm:$0xff] %v544_v17  ;;  %vm319_vm3 = vcmask 138368   ;;  %s546_s2 = smov [#allocation8]   ;;  %s328_s6 = sshll.u32 %s591_s3, 4  ;;  %s329_s6 = int_to_ptr.hbm [resolvable:$true] %s328_s6 }
  0x1c   :  { %189 = vmatpush.bf16.msra.mxu2 %v371_v35  ;;  %v293_v61 = vperm.slane %v291_v58, 0  ;;  %308 = vst [vmem:[#allocation8 + $0x8] sm:$0xff] %v544_v17  ;;  %s326_s30 = sshll.u32 %s546_s2, 4  ;;  %s547_s7 = smov 128   ;;  %s327_s30 = int_to_ptr.vmem [resolvable:$true] %s326_s30 }
  0x1d   :  { %243 = vmatpush.bf16.msra.mxu3 %v388_v49  ;;  %s548_s8 = smov 8  }
  0x1f   :  { %148 = vmatpush.bf16.msra.mxu1 %v354_v15 }
  0x21   :  { %244 = vmatpush.bf16.msra.mxu3 %v384_v52 }
  0x25   :  { %245 = vmatpush.bf16.msra.mxu3 %v380_v55 }
  0x92   :  { %v93_v19 = vpop.f32.mrf.mxu0 }
  0x93   :  { %v94_v21 = vadd.f32 %v429_v20, %v93_v19 }
  0x95   :  { %v98_v24 = vmax.f32 %v94_v21, 0.0 }
  0x9a   :  { %v95_v22 = vpop.f32.mrf.mxu0 }
  0x9b   :  { %v96_v23 = vadd.f32 %v429_v20, %v95_v22  ;;  %v434_v20 = vld [vmem:[#allocation7 + $0x3] ss:$0 sm:$0xff] }
  0x9d   :  { %v99_v25 = vmax.f32 %v96_v23, 0.0 }
  0x9f   :  { %v100_v26 = vpack.c.bf16 %v99_v25, %v98_v24 }
  0xa1   :  { %367 = vmatmul.msk.bf16.vlgmr.msra.gmra.mxu1 %vm137_vm1, %v100_v26 }
 0x11e   :  { %v150_v36 = vpop.f32.mrf.mxu1 }
 0x11f   :  { %v151_v38 = vadd.f32 %v430_v37, %v150_v36 }
 0x121   :  { %v155_v41 = vmax.f32 %v151_v38, 0.0 }
 0x126   :  { %v152_v39 = vpop.f32.mrf.mxu1 }
 0x127   :  { %v153_v40 = vadd.f32 %v430_v37, %v152_v39 }
 0x129   :  { %v156_v42 = vmax.f32 %v153_v40, 0.0 }
 0x12b   :  { %v157_v43 = vpack.c.bf16 %v156_v42, %v155_v41 }
 0x12d   :  { %376 = vmatmul.msk.bf16.vlgmr.msra.gmra.mxu2 %vm178_vm2, %v157_v43  ;;  %402 = vmatmul.msk.bf16.vlgmr.msrb.gmra.mxu0 %vm178_vm2, %v157_v43 }
 0x1aa   :  { %v283_v59 = vpop.f32.mrf.mxu0 }
 0x1ab   :  { %v284_v60 = vadd.f32 %v431_v57, %v283_v59 }
 0x1ad   :  { %v288_v62 = vmax.f32 %v284_v60, 0.0 }
 0x1af   :  { %v294_v63 = vmul.f32 %v293_v61, %v288_v62 }
 0x1b0   :  { %v191_v0 = vpop.f32.mrf.mxu2 }
 0x1b1   :  { %v296_v1 = vsel %vm80_vm0, %v294_v63, 0.0  ;;  %v192_v6 = vadd.f32 %v432_v3, %v191_v0 }
 0x1b2   :  { %v285_v2 = vpop.f32.mrf.mxu0  ;;  %297 = vadd.xlane.f32.xlu0 %v296_v1 }
 0x1b3   :  { %v286_v4 = vadd.f32 %v431_v57, %v285_v2  ;;  %v196_v11 = vmax.f32 %v192_v6, 0.0 }
 0x1b5   :  { %v289_v5 = vmax.f32 %v286_v4, 0.0 }
 0x1b7   :  { %v295_v7 = vmul.f32 %v293_v61, %v289_v5 }
 0x1b8   :  { %v193_v8 = vpop.f32.mrf.mxu2 }
 0x1b9   :  { %v194_v9 = vadd.f32 %v432_v3, %v193_v8  ;;  %v299_v10 = vsel %vm80_vm0, %v295_v7, 0.0 }
 0x1ba   :  { %300 = vadd.xlane.f32.xlu0 %v299_v10 }
 0x1bb   :  { %v197_v12 = vmax.f32 %v194_v9, 0.0 }
 0x1bd   :  { %v198_v13 = vpack.c.bf16 %v197_v12, %v196_v11 }
 0x1bf   :  { %393 = vmatmul.msk.bf16.vlgmr.msra.gmra.mxu3 %vm137_vm1, %v198_v13 }
 0x225   :  { %v298_v15 = vpop.xlane.xlu0 %297 }
 0x226   :  { %v305_v16 = vadd.f32 %v433_v14, %v298_v15 }
 0x228   :  { %313 = vrot.lane.b32.xlu1 %v305_v16, %s545_s0 }
 0x22d   :  { %v301_v18 = vpop.xlane.xlu0 %300 }
 0x22e   :  { %v306_v19 = vadd.f32 %v433_v14, %v301_v18 }
 0x230   :  { %315 = vrot.lane.b32.xlu1 %v306_v19, %s545_s0 }
 0x242   :  { %v247_v21 = vpop.f32.mrf.mxu3 }
 0x243   :  { %v248_v22 = vadd.f32 %v434_v20, %v247_v21 }
 0x245   :  { %v252_v23 = vmax.f32 %v248_v22, 0.0 }
 0x247   :  { %309 = vst.msk [vmem:[#allocation8] sm:$0xff] %vm80_vm0, %v252_v23 }
 0x24a   :  { %v249_v24 = vpop.f32.mrf.mxu3 }
 0x24b   :  { %v250_v25 = vadd.f32 %v434_v20, %v249_v24 }
 0x24d   :  { %v253_v26 = vmax.f32 %v250_v25, 0.0 }
 0x24f   :  { %310 = vst.msk [vmem:[#allocation8 + $0x8] sm:$0xff] %vm80_vm0, %v253_v26 }
 0x29a   :  { %v314_v27 = vpop.permute.xlu1 %313 }
 0x29b   :  { %320 = vst.msk [vmem:[#allocation8] sm:$0xff] %vm319_vm3, %v314_v27 }
 0x2a2   :  { %v316_v28 = vpop.permute.xlu1 %315 }
 0x2a3   :  { %321 = vst.msk [vmem:[#allocation8 + $0x8] sm:$0xff] %vm319_vm3, %v316_v28 }
 0x2a4   :  { %334 = dma.vmem_to_hbm [thread:$0]  %s327_s30, 256, %s329_s6, [#allocation4], %s547_s7, %s547_s7, %s548_s8  }
 0x2a5   :  { %535 = dma.done.wait [#allocation4], 256  }
 0x2a6   :  { %536 = vsyncadd [#allocation4], 4294967040 }
 0x2a7   :  { %339 = vsyncpa [#allocation3], 1 }
 0x2a8   :  { %340 = vsyncpa [#allocation6], 1 }
 0x2a9   :  { %341 = vsyncpa [#allocation4], 1 }

</bundles_post_ra>
